<compile_context>
chip_gen: v7x
topology: tpu7x:2x2x1
jax: 0.10.0
libtpu: 0.0.40
codegen_flags: <defaults>
</compile_context>

<pallas_src>
import jax
import jax.numpy as jnp
from jax.experimental import pallas as pl
from jax.experimental.pallas import tpu as pltpu

LANE = 128
SUB = 16   # batch-tile granularity: multiple of the bf16 sublane tile (16),
           # which is also a multiple of the f32 sublane tile (8).


def _round_up(x, m):
    return ((x + m - 1) // m) * m


def _pad_dim(d):
    # Lane-dense padding.  Dims >= 256 round to 256 so v6e/v7x's 2x256^2 MXU
    # tiles stay fully fed (typical hidden dims 512/1024 are unchanged by
    # this); smaller dims use 128 (v5e MXU width / minimum lane tile).
    return _round_up(d, 256) if d >= 256 else _round_up(d, LANE)


def actor_kernel(obs_ref,                  # [TILE_B, R_pad]  (weight dtype)
                 w1_ref, b1_ref,           # [R_pad, H_pad],  [1, H_pad] f32
                 w2_ref, b2_ref,           # [H_pad, H_pad],  [1, H_pad] f32
                 w3_ref, b3_ref,           # [H_pad, A_pad],  [1, A_pad] f32
                 mu_ref):                  # [TILE_B, A_pad]
    # Uniform-dtype MXU dots (bf16xbf16 or f32xf32), f32 accumulation.
    # Biases already f32 -> no per-step casts; elementwise math stays f32.
    x = obs_ref[...]
    h1 = jnp.dot(x, w1_ref[...], preferred_element_type=jnp.float32)
    h1 = jnp.maximum(h1 + b1_ref[...], 0.0)

    h2 = jnp.dot(h1.astype(w2_ref.dtype), w2_ref[...],
                 preferred_element_type=jnp.float32)
    h2 = jnp.maximum(h2 + b2_ref[...], 0.0)

    mu = jnp.tanh(jnp.dot(h2.astype(w3_ref.dtype), w3_ref[...],
                          preferred_element_type=jnp.float32) + b3_ref[...])
    mu_ref[...] = mu.astype(mu_ref.dtype)


def pad_actor_params(params):
    """Zero-pad weights to lane-dense slabs ONCE (call at init, not per step).

    Zero padding is exact: padded K rows/cols contribute 0 to every matmul and
    padded hidden units stay 0 through ReLU.  Biases are stored pre-cast to
    f32 (they are tiny).  Returns (padded_params, (R, H, A))."""
    R, H = params["w1"].shape
    A = params["w3"].shape[1]
    R_pad, H_pad, A_pad = _pad_dim(R), _pad_dim(H), _pad_dim(A)
    wdt = params["w1"].dtype

    def pw(w, r, c):
        return jnp.zeros((r, c), wdt).at[: w.shape[0], : w.shape[1]].set(w)

    def pb(b, c):
        return (jnp.zeros((1, c), jnp.float32)
                .at[:, : b.shape[1]].set(b.astype(jnp.float32)))

    padded = dict(
        w1=pw(params["w1"], R_pad, H_pad), b1=pb(params["b1"], H_pad),
        w2=pw(params["w2"], H_pad, H_pad), b2=pb(params["b2"], H_pad),
        w3=pw(params["w3"], H_pad, A_pad), b3=pb(params["b3"], A_pad),
    )
    return padded, (R, H, A)


def actor_forward(obs, padded_params, dims, std_scalar, *,
                  max_tile_b=512, out_dtype=jnp.float32):
    """Returns (mu, std) — the parameters of the TruncatedNormal the PyTorch
    module wraps them in.  `padded_params` must come from pad_actor_params."""
    p = padded_params
    R, H, A = dims
    B = obs.shape[0]
    R_pad, H_pad = p["w1"].shape
    A_pad = p["w3"].shape[1]
    wdt = p["w1"].dtype

    # ---- batch tiling -----------------------------------------------------
    # >= 2 grid steps so "parallel" actually shards both v7x TensorCores;
    # tile_b adaptively near max_tile_b with <16 rows of waste per step.
    b16 = _round_up(B, SUB)
    n_steps = max(2, -(-b16 // max_tile_b))            # cdiv
    tile_b = _round_up(-(-b16 // n_steps), SUB)
    b_pad = tile_b * n_steps

    # ---- obs: cast to weight dtype (uniform MXU operands), pad only if needed
    obs_c = obs.astype(wdt)
    if (b_pad != B) or (R_pad != R):
        obs_p = jnp.zeros((b_pad, R_pad), wdt).at[:B, :R].set(obs_c)
    else:
        obs_p = obs_c

    # ---- VMEM budget: single-buffered resident weights + double-buffered
    # obs/mu tiles (+25% / 2 MiB headroom), capped at v7x's 64 MiB.
    wbytes = ((p["w1"].size + p["w2"].size + p["w3"].size) * wdt.itemsize
              + (p["b1"].size + p["b2"].size + p["b3"].size) * 4)
    iobytes = (2 * tile_b * R_pad * wdt.itemsize
               + 2 * tile_b * A_pad * jnp.dtype(out_dtype).itemsize)
    vmem_limit = int(min(64 * 1024 * 1024,
                         max(8 * 1024 * 1024,
                             (wbytes + iobytes) * 5 // 4 + (2 << 20))))

    cost = pl.CostEstimate(
        flops=int(2 * b_pad * (R_pad * H_pad + H_pad * H_pad + H_pad * A_pad)),
        transcendentals=int(b_pad * A_pad),
        bytes_accessed=int(obs_p.size * wdt.itemsize + wbytes
                           + b_pad * A_pad * jnp.dtype(out_dtype).itemsize),
    )

    # Whole-array VMEM residency for weights/biases: fetched once, single
    # buffer (no double-buffer waste on grid-invariant blocks).
    resident = pl.BlockSpec(memory_space=pltpu.MemorySpace.VMEM)

    mu_pad = pl.pallas_call(
        actor_kernel,
        out_shape=jax.ShapeDtypeStruct((b_pad, A_pad), out_dtype),
        grid=(n_steps,),
        in_specs=[
            pl.BlockSpec((tile_b, R_pad), lambda i: (i, 0)),   # obs: batch-tiled
            resident, resident,                                # W1, b1
            resident, resident,                                # W2, b2
            resident, resident,                                # W3, b3
        ],
        out_specs=pl.BlockSpec((tile_b, A_pad), lambda i: (i, 0)),
        compiler_params=pltpu.CompilerParams(
            dimension_semantics=("parallel",),                 # megacore on v7x
            vmem_limit_bytes=vmem_limit),
        cost_estimate=cost,
    )(obs_p, p["w1"], p["b1"], p["w2"], p["b2"], p["w3"], p["b3"])

    # NOTE: the [:B, :A] slice is one extra pass over the lane-dense slab;
    # callers that can consume the padded slab should take mu_pad directly.
    mu = mu_pad[:B, :A]
    # std is a constant broadcast — no kernel work needed.
    std = jnp.full((B, A), std_scalar, dtype=mu.dtype)
    # TODO(synk): utils.TruncatedNormal is a torch.distributions object
    # (sampling / clamping logic), not a tensor op — we return its parameters.
    return mu, std


def init_actor_params(key, repr_dim, hidden_dim, action_dim, dtype=jnp.float32):
    """Deterministic synthetic init (mimics the scale of utils.weight_init)."""
    k1, k2, k3 = jax.random.split(key, 3)

    def lin(k, fan_in, fan_out):
        w = (jax.random.normal(k, (fan_in, fan_out), jnp.float32)
             / jnp.sqrt(fan_in)).astype(dtype)
        b = jnp.zeros((1, fan_out), dtype)
        return w, b

    w1, b1 = lin(k1, repr_dim, hidden_dim)
    w2, b2 = lin(k2, hidden_dim, hidden_dim)
    w3, b3 = lin(k3, hidden_dim, action_dim)
    return dict(w1=w1, b1=b1, w2=w2, b2=b2, w3=w3, b3=b3)


def ref_forward(obs, p, s):
    """Pure-JAX reference with the same dtype policy as the kernel."""
    f32 = jnp.float32
    x = obs.astype(p["w1"].dtype)
    h1 = jnp.maximum(jnp.dot(x, p["w1"], preferred_element_type=f32)
                     + p["b1"].astype(f32), 0.0)
    h2 = jnp.maximum(jnp.dot(h1.astype(p["w2"].dtype), p["w2"],
                             preferred_element_type=f32)
                     + p["b2"].astype(f32), 0.0)
    mu = jnp.tanh(jnp.dot(h2.astype(p["w3"].dtype), p["w3"],
                          preferred_element_type=f32)
                  + p["b3"].astype(f32))
    return mu, jnp.full(mu.shape, s, mu.dtype)


if __name__ == "__main__":
    B, REPR_DIM, HIDDEN_DIM, ACTION_DIM = 8, 32, 32, 8
    STD = 0.1

    key = jax.random.PRNGKey(0)
    k_obs, k_params = jax.random.split(key)
    obs = jax.random.normal(k_obs, (B, REPR_DIM), jnp.float32)

    # --- f32 weights ---------------------------------------------------
    params_f32 = init_actor_params(k_params, REPR_DIM, HIDDEN_DIM, ACTION_DIM,
                                   dtype=jnp.float32)
    padded_f32, dims_f32 = pad_actor_params(params_f32)   # pad once, at init

    mu, std = actor_forward(obs, padded_f32, dims_f32, STD)
    jax.block_until_ready((mu, std))
    mu_r, std_r = ref_forward(obs, params_f32, STD)
    assert mu.shape == (B, ACTION_DIM) and std.shape == (B, ACTION_DIM)
    assert jnp.allclose(mu, mu_r, atol=1e-5, rtol=1e-5)
    assert jnp.allclose(std, std_r, atol=1e-6)

    # --- bf16 weights + activations, bf16 mu output ----------------------
    params_bf16 = init_actor_params(k_params, REPR_DIM, HIDDEN_DIM, ACTION_DIM,
                                    dtype=jnp.bfloat16)
    padded_bf16, dims_bf16 = pad_actor_params(params_bf16)
    mu_b, std_b = actor_forward(obs, padded_bf16, dims_bf16, STD,
                                out_dtype=jnp.bfloat16)
    jax.block_until_ready((mu_b, std_b))
    mu_br, _ = ref_forward(obs, params_bf16, STD)
    assert mu_b.dtype == jnp.bfloat16
    assert jnp.allclose(mu_b.astype(jnp.float32), mu_br.astype(jnp.float32),
                        atol=5e-2, rtol=5e-2)

    # --- larger batch: exercises the multi-step grid + adaptive tiling ---
    B2 = 600
    obs2 = jax.random.normal(k_obs, (B2, REPR_DIM), jnp.float32)
    mu2, std2 = actor_forward(obs2, padded_f32, dims_f32, STD)
    jax.block_until_ready((mu2, std2))
    mu2_r, _ = ref_forward(obs2, params_f32, STD)
    assert mu2.shape == (B2, ACTION_DIM)
    assert jnp.allclose(mu2, mu2_r, atol=1e-5, rtol=1e-5)

    print("KERNEL_OK")
</pallas_src>

<mosaic_0001>
module attributes {stable_mosaic.version = 11 : i64} {
  func.func @actor_kernel(%arg0: i32, %arg1: memref<16x128xf32, #tpu.memory_space<vmem>>, %arg2: memref<128x128xf32, #tpu.memory_space<vmem>>, %arg3: memref<1x128xf32, #tpu.memory_space<vmem>>, %arg4: memref<128x128xf32, #tpu.memory_space<vmem>>, %arg5: memref<1x128xf32, #tpu.memory_space<vmem>>, %arg6: memref<128x128xf32, #tpu.memory_space<vmem>>, %arg7: memref<1x128xf32, #tpu.memory_space<vmem>>, %arg8: memref<16x128xf32, #tpu.memory_space<vmem>>) attributes {dimension_semantics = [#tpu.dimension_semantics<parallel>], iteration_bounds = array<i64: 2>, scalar_prefetch = 0 : i64, scratch_operands = 0 : i64, tpu.core_type = #tpu.core_type<tc>, window_params = [{transform_indices = @transform_0, window_bounds = array<i64: 16, 128>}, {pipeline_mode = #tpu.pipeline_mode<synchronous>, transform_indices = @transform_1, window_bounds = array<i64: 128, 128>}, {pipeline_mode = #tpu.pipeline_mode<synchronous>, transform_indices = @transform_2, window_bounds = array<i64: 1, 128>}, {pipeline_mode = #tpu.pipeline_mode<synchronous>, transform_indices = @transform_3, window_bounds = array<i64: 128, 128>}, {pipeline_mode = #tpu.pipeline_mode<synchronous>, transform_indices = @transform_4, window_bounds = array<i64: 1, 128>}, {pipeline_mode = #tpu.pipeline_mode<synchronous>, transform_indices = @transform_5, window_bounds = array<i64: 128, 128>}, {pipeline_mode = #tpu.pipeline_mode<synchronous>, transform_indices = @transform_6, window_bounds = array<i64: 1, 128>}, {transform_indices = @transform_7, window_bounds = array<i64: 16, 128>}]} {
    %c0 = arith.constant 0 : index
    %c0_0 = arith.constant 0 : index
    %0 = vector.load %arg1[%c0, %c0_0] : memref<16x128xf32, #tpu.memory_space<vmem>>, vector<16x128xf32>
    %c0_1 = arith.constant 0 : index
    %c0_2 = arith.constant 0 : index
    %1 = vector.load %arg2[%c0_1, %c0_2] : memref<128x128xf32, #tpu.memory_space<vmem>>, vector<128x128xf32>
    %cst = arith.constant dense<0.000000e+00> : vector<16x128xf32>
    %2 = tpu.matmul %0, %1, %cst {dimension_numbers = #tpu.dot_dimension_numbers<[1], [0], [0], [1], [0, 0, 1, 1], [], []>} : vector<16x128xf32>, vector<128x128xf32>, vector<16x128xf32> -> vector<16x128xf32>
    %c0_3 = arith.constant 0 : index
    %c0_4 = arith.constant 0 : index
    %3 = vector.load %arg3[%c0_3, %c0_4] : memref<1x128xf32, #tpu.memory_space<vmem>>, vector<1x128xf32>
    %4 = vector.broadcast %3 : vector<1x128xf32> to vector<16x128xf32>
    %5 = arith.addf %2, %4 : vector<16x128xf32>
    %cst_5 = arith.constant 0.000000e+00 : f32
    %6 = vector.broadcast %cst_5 : f32 to vector<16x128xf32>
    %7 = arith.maximumf %5, %6 : vector<16x128xf32>
    %c0_6 = arith.constant 0 : index
    %c0_7 = arith.constant 0 : index
    %8 = vector.load %arg4[%c0_6, %c0_7] : memref<128x128xf32, #tpu.memory_space<vmem>>, vector<128x128xf32>
    %cst_8 = arith.constant dense<0.000000e+00> : vector<16x128xf32>
    %9 = tpu.matmul %7, %8, %cst_8 {dimension_numbers = #tpu.dot_dimension_numbers<[1], [0], [0], [1], [0, 0, 1, 1], [], []>} : vector<16x128xf32>, vector<128x128xf32>, vector<16x128xf32> -> vector<16x128xf32>
    %c0_9 = arith.constant 0 : index
    %c0_10 = arith.constant 0 : index
    %10 = vector.load %arg5[%c0_9, %c0_10] : memref<1x128xf32, #tpu.memory_space<vmem>>, vector<1x128xf32>
    %11 = vector.broadcast %10 : vector<1x128xf32> to vector<16x128xf32>
    %12 = arith.addf %9, %11 : vector<16x128xf32>
    %cst_11 = arith.constant 0.000000e+00 : f32
    %13 = vector.broadcast %cst_11 : f32 to vector<16x128xf32>
    %14 = arith.maximumf %12, %13 : vector<16x128xf32>
    %c0_12 = arith.constant 0 : index
    %c0_13 = arith.constant 0 : index
    %15 = vector.load %arg6[%c0_12, %c0_13] : memref<128x128xf32, #tpu.memory_space<vmem>>, vector<128x128xf32>
    %cst_14 = arith.constant dense<0.000000e+00> : vector<16x128xf32>
    %16 = tpu.matmul %14, %15, %cst_14 {dimension_numbers = #tpu.dot_dimension_numbers<[1], [0], [0], [1], [0, 0, 1, 1], [], []>} : vector<16x128xf32>, vector<128x128xf32>, vector<16x128xf32> -> vector<16x128xf32>
    %c0_15 = arith.constant 0 : index
    %c0_16 = arith.constant 0 : index
    %17 = vector.load %arg7[%c0_15, %c0_16] : memref<1x128xf32, #tpu.memory_space<vmem>>, vector<1x128xf32>
    %18 = vector.broadcast %17 : vector<1x128xf32> to vector<16x128xf32>
    %19 = arith.addf %16, %18 : vector<16x128xf32>
    %20 = math.tanh %19 : vector<16x128xf32>
    %c0_17 = arith.constant 0 : index
    %c0_18 = arith.constant 0 : index
    %21 = vector.load %arg8[%c0_17, %c0_18] : memref<16x128xf32, #tpu.memory_space<vmem>>, vector<16x128xf32>
    tpu.vector_store %arg8[%c0_17, %c0_18], %20 {strides = array<i32>} : memref<16x128xf32, #tpu.memory_space<vmem>>, vector<16x128xf32>,
    return
  }
  func.func @transform_0(%arg0: i32) -> (i32, i32) {
    %c0_i32 = arith.constant 0 : i32
    %c0_i32_0 = arith.constant 0 : i32
    return %arg0, %c0_i32 : i32, i32
  }
  func.func @transform_1(%arg0: i32) -> (i32, i32) {
    %c0_i32 = arith.constant 0 : i32
    %c0_i32_0 = arith.constant 0 : i32
    %c0_i32_1 = arith.constant 0 : i32
    return %c0_i32, %c0_i32_0 : i32, i32
  }
  func.func @transform_2(%arg0: i32) -> (i32, i32) {
    %c0_i32 = arith.constant 0 : i32
    %c0_i32_0 = arith.constant 0 : i32
    %c0_i32_1 = arith.constant 0 : i32
    return %c0_i32, %c0_i32_0 : i32, i32
  }
  func.func @transform_3(%arg0: i32) -> (i32, i32) {
    %c0_i32 = arith.constant 0 : i32
    %c0_i32_0 = arith.constant 0 : i32
    %c0_i32_1 = arith.constant 0 : i32
    return %c0_i32, %c0_i32_0 : i32, i32
  }
  func.func @transform_4(%arg0: i32) -> (i32, i32) {
    %c0_i32 = arith.constant 0 : i32
    %c0_i32_0 = arith.constant 0 : i32
    %c0_i32_1 = arith.constant 0 : i32
    return %c0_i32, %c0_i32_0 : i32, i32
  }
  func.func @transform_5(%arg0: i32) -> (i32, i32) {
    %c0_i32 = arith.constant 0 : i32
    %c0_i32_0 = arith.constant 0 : i32
    %c0_i32_1 = arith.constant 0 : i32
    return %c0_i32, %c0_i32_0 : i32, i32
  }
  func.func @transform_6(%arg0: i32) -> (i32, i32) {
    %c0_i32 = arith.constant 0 : i32
    %c0_i32_0 = arith.constant 0 : i32
    %c0_i32_1 = arith.constant 0 : i32
    return %c0_i32, %c0_i32_0 : i32, i32
  }
  func.func @transform_7(%arg0: i32) -> (i32, i32) {
    %c0_i32 = arith.constant 0 : i32
    %c0_i32_0 = arith.constant 0 : i32
    return %arg0, %c0_i32 : i32, i32
  }
}

</mosaic_0001>

<bundles_post_ra>
// kernel: tpu_custom_call.1
= control target key start
LH: loop header
LB: loop body
LE: loop exit
PB: predicated region body
PF: predicated region fallthrough
CT: control target
= control target key end

     0   :  { %12 = vsyncpa [#allocation3], 0  ;;  %s1655_s0 = inlined_call_operand.hbm [shape: f32[32,128], index: 0, kind: input, shape index: {}]   ;;  %s1656_s1 = inlined_call_operand.hbm [shape: f32[128,128], index: 1, kind: input, shape index: {}]   ;;  %s1657_s2 = inlined_call_operand.vmem [shape: f32[1,128], index: 2, kind: input, shape index: {}]   ;;  %s1658_s3 = inlined_call_operand.hbm [shape: f32[128,128], index: 3, kind: input, shape index: {}]   ;;  %s1659_s4 = inlined_call_operand.vmem [shape: f32[1,128], index: 4, kind: input, shape index: {}]   ;;  %s1660_s5 = inlined_call_operand.hbm [shape: f32[128,128], index: 5, kind: input, shape index: {}]   ;;  %s1661_s6 = inlined_call_operand.vmem [shape: f32[1,128], index: 6, kind: input, shape index: {}]   ;;  %s1662_s7 = inlined_call_operand.hbm [shape: f32[32,128], index: 7, kind: output, shape index: {}]  }
   0x1   :  { %14 = vsyncpa [#allocation3 + $0x1], 0 }
   0x2   :  { %15 = vsyncpa [#allocation6], 0 }
   0x3   :  { %16 = vsyncpa [#allocation9], 0 }
   0x4   :  { %17 = vsyncpa [#allocation4], 0 }
   0x5   :  { %19 = vsyncpa [#allocation4 + $0x1], 0  ;;  %s1367_s24 = smov 0   ;;  %s1369_s25 = smov 0  }
   0x6   :  { %s1371_s26 = smov 0   ;;  %s1373_s27 = smov 0  }
   0x7 LB: > { %s1388_s28 = sadd.s32 4294967295, %s1316_s27   ;;  %s763_s29 = sadd.s32 4294967294, %s1316_s27   ;;  %s1316_s27 = sphi %s1373_s27, %s1688_s27   ;;  %s1312_s26 = sphi %s1371_s26, %s1687_s26   ;;  %s1308_s25 = sphi %s1369_s25, %s1686_s25   ;;  %s1304_s24 = sphi %s1367_s24, %s1685_s24  }
   0x8   : > { %p45_p0 = scmp.ne.s32.totalorder %s1308_s25, %s1304_s24  ;;  %p1663_p1 = scmp.eq.s32.totalorder %s1388_s28, 0 }
   0x9   : > { %p201_p3 = scmp.eq.s32.totalorder %s763_s29, 1  ;;  %p764_p5 = scmp.ge.s32.totalorder %s1316_s27, 1 }
   0xa   : > { %p1397_p4 = por %p1663_p1, %p45_p0  ;;  %p208_p7 = scmp.lt.s32.totalorder %s1316_s27, 3 }
   0xb   : > { %p1402_p6 = por %p201_p3, %p45_p0  ;;  %s1318_s10 = smov [#allocation5]  }
   0xc   : > { %s1667_s30 = scalar_select %p1397_p4, 1, 0 }
   0xd   : > { %s1668_s8 = scalar_select %p1402_p6, 1, 0 }
   0xe   : > { %p1407_p8 = pnand %p764_p5, %p208_p7  ;;  %s220_s11 = sshll.u32 %s1318_s10, 4  ;;  %s1411_s11 = int_to_ptr.vmem [resolvable:$true] %s220_s11 }
   0xf   : > { %1669 = sst [smem:[#allocation15_spill]] %s1668_s8  ;;  %s1319_s13 = smov [#allocation7]  }
  0x10   : > { %s1670_s9 = scalar_select %p1407_p8, 1, 0 }
  0x11   : > { %p1059_p9 = pneg %p1407_p8  ;;  %s236_s14 = sshll.u32 %s1319_s13, 4  ;;  %s1422_s14 = int_to_ptr.vmem [resolvable:$true] %s236_s14 }
  0x12   : > { %s1320_s15 = smov [#allocation8]   ;;  %s1128_s19 = scalar_lea.hbm %s1656_s1, 2048 }
  0x13   : > { %p1418_p11 = pnand %p1059_p9, %p1663_p1  ;;  %s1424_s16 = sshll.u32 %s1320_s15, 4  ;;  %s253_s16 = int_to_ptr.vmem [resolvable:$true] %s1424_s16 }
  0x14   : > { %p1129_p12 = scmp.ne.s32.totalorder %s1656_s1, %s1128_s19  ;;  %p1135_p5 = scmp.lt.u32.totalorder %s1128_s19, %s1656_s1 }
  0x15   : > { %p1434_p13 = pneg %p1418_p11 }
  0x17   : > { %p1131_p0 = pnand %p1434_p13, %p1129_p12 }
  0x19   : > { %p1132_p3 = pneg %p1131_p0 }
  0x1b   : > { %p1137_p7 = pnand %p1135_p5, %p1132_p3 }
  0x1d   : > { %1140 = shalt.err (!%p1137_p7)
}
  0x1e   : > { %s1141_s10 = scalar_lea.vmem %s1411_s11, 2048  ;;  %p1149_p2 = scmp.lt.s32.totalorder %s1411_s11, %s1411_s11 }
  0x1f   : > { %p1142_p9 = scmp.ne.s32.totalorder %s1411_s11, %s1141_s10  ;;  %p1150_p6 = scmp.lt.s32.totalorder %s1141_s10, %s1141_s10 }
  0x21   : > { %p1144_p10 = pnand %p1142_p9, %p1434_p13  ;;  %p1151_p12 = por %p1150_p6, %p1149_p2 }
  0x23   : > { %p1145_p1 = pneg %p1144_p10 }
  0x25   : > { %p1152_p0 = pnand %p1151_p12, %p1145_p1 }
  0x27   : > { %1155 = shalt.err (!%p1152_p0)
}
  0x28   : > { %s1321_s13 = smov 128   ;;  %s1322_s15 = smov 8  }
  0x29   : > { %1062 = dma.hbm_to_vmem [thread:$0]  (!%p1418_p11), %s1656_s1, 2048, %s1411_s11, [#allocation6], %s1321_s13, %s1321_s13, %s1322_s15  }
  0x2a   : > { %s1156_s21 = scalar_lea.hbm %s1658_s3, 2048 }
  0x2b   : > { %p1157_p1 = scmp.ne.s32.totalorder %s1658_s3, %s1156_s21  ;;  %p1163_p10 = scmp.lt.u32.totalorder %s1156_s21, %s1658_s3 }
  0x2d   : > { %p1159_p2 = pnand %p1157_p1, %p1434_p13 }
  0x2f   : > { %p1160_p6 = pneg %p1159_p2 }
  0x31   : > { %p1165_p3 = pnand %p1163_p10, %p1160_p6 }
  0x33   : > { %1168 = shalt.err (!%p1165_p3)
}
  0x34   : > { %s1169_s11 = scalar_lea.vmem %s1422_s14, 2048  ;;  %p1177_p12 = scmp.lt.s32.totalorder %s1422_s14, %s1422_s14 }
  0x35   : > { %p1170_p5 = scmp.ne.s32.totalorder %s1422_s14, %s1169_s11  ;;  %p1178_p0 = scmp.lt.s32.totalorder %s1169_s11, %s1169_s11 }
  0x37   : > { %p1172_p7 = pnand %p1170_p5, %p1434_p13  ;;  %p1179_p1 = por %p1178_p0, %p1177_p12 }
  0x39   : > { %p1173_p9 = pneg %p1172_p7 }
  0x3b   : > { %p1180_p2 = pnand %p1179_p1, %p1173_p9 }
  0x3d   : > { %1183 = shalt.err (!%p1180_p2)
}
  0x3e   : > { %1065 = dma.hbm_to_vmem [thread:$0]  (!%p1418_p11), %s1658_s3, 2048, %s1422_s14, [#allocation6], %s1321_s13, %s1321_s13, %s1322_s15  }
  0x3f   : > { %s1184_s20 = scalar_lea.hbm %s1660_s5, 2048 }
  0x40   : > { %p1185_p6 = scmp.ne.s32.totalorder %s1660_s5, %s1184_s20  ;;  %p1191_p5 = scmp.lt.u32.totalorder %s1184_s20, %s1660_s5 }
  0x42   : > { %p1187_p10 = pnand %p1185_p6, %p1434_p13 }
  0x44   : > { %p1188_p3 = pneg %p1187_p10 }
  0x46   : > { %p1193_p7 = pnand %p1191_p5, %p1188_p3 }
  0x48   : > { %1196 = shalt.err (!%p1193_p7)
}
  0x49   : > { %s1197_s11 = scalar_lea.vmem %s253_s16, 2048  ;;  %p1205_p1 = scmp.lt.s32.totalorder %s253_s16, %s253_s16 }
  0x4a   : > { %p1198_p9 = scmp.ne.s32.totalorder %s253_s16, %s1197_s11  ;;  %p1206_p2 = scmp.lt.s32.totalorder %s1197_s11, %s1197_s11 }
  0x4c   : > { %p1200_p12 = pnand %p1198_p9, %p1434_p13  ;;  %p1207_p4 = por %p1206_p2, %p1205_p1 }
  0x4e   : > { %p1201_p0 = pneg %p1200_p12 }
  0x50   : > { %p1208_p8 = pnand %p1207_p4, %p1201_p0 }
  0x52   : > { %1211 = shalt.err (!%p1208_p8)
}
  0x53   : > { %1068 = dma.hbm_to_vmem [thread:$0]  (!%p1418_p11), %s1660_s5, 2048, %s253_s16, [#allocation9], %s1321_s13, %s1321_s13, %s1322_s15  }
  0x54   : > { %s1507_s22 = sadd.s32 1, %s1316_s27   ;;  %s32_s17 = sadd.s32 1, %s1312_s26 }
  0x55   : > { %s29_s12 = ssub.s32 %s1316_s27, %s1507_s22  ;;  %p39_p8 = scmp.ne.s32.totalorder %s1312_s26, %s1308_s25 }
  0x56   : > { %p30_p4 = scmp.eq.s32.totalorder %s29_s12, 0  ;;  %p40_p13 = scmp.eq.s32.totalorder %s1316_s27, 0 }
  0x57   : > { %p1080_p6 = scmp.lt.s32.totalorder %s1316_s27, 2  ;;  %p1673_p3 = scmp.eq.s32.totalorder %s1388_s28, 1 }
  0x58   : > { %s1517_s18 = scalar_select %p30_p4, %s1312_s26, %s32_s17  }
  0x59   : > { %p41_p10 = por %p40_p13, %p39_p8  ;;  %p1521_p5 = por %p1673_p3, %p39_p8 }
  0x5a   : > { %s269_s20 = sand.u32 1, %s1312_s26   ;;  %s786_s21 = sshll.u32 %s1316_s27, 8 }
  0x5b   : > { %s769_s16 = sshll.u32 %s269_s20, 4  ;;  %s1530_s10 = scalar_lea.hbm %s1655_s0, %s786_s21 }
  0x5c   : > { %s273_s11 = scalar_lea.vmem [#allocation2], %s769_s16  ;;  %p1532_p11 = pnand %p1080_p6, %p41_p10 }
  0x5d   : > { %s280_s14 = sshll.u32 %s273_s11, 4  ;;  %s1538_s12 = scalar_lea.sflag [#allocation3], %s269_s20  ;;  %s1536_s14 = int_to_ptr.vmem [resolvable:$true] %s280_s14 }
  0x5e   : > { %s1212_s17 = scalar_lea.hbm %s1530_s10, 256  ;;  %p1214_p9 = pneg %p1532_p11 }
  0x5f   : > { %p1213_p7 = scmp.ne.s32.totalorder %s1530_s10, %s1212_s17  ;;  %s1217_s23 = scalar_lea.hbm %s1655_s0, 512 }
  0x60   : > { %p1218_p1 = scmp.lt.u32.totalorder %s1530_s10, %s1655_s0  ;;  %p1219_p2 = scmp.lt.u32.totalorder %s1217_s23, %s1212_s17 }
  0x61   : > { %p1215_p12 = pnand %p1214_p9, %p1213_p7  ;;  %p1221_p8 = scmp.lt.u32.totalorder %s1212_s17, %s1530_s10 }
  0x62   : > { %p1220_p4 = por %p1219_p2, %p1218_p1 }
  0x63   : > { %p1216_p0 = pneg %p1215_p12 }
  0x64   : > { %p1222_p13 = por %p1221_p8, %p1220_p4 }
  0x66   : > { %p1223_p6 = pnand %p1222_p13, %p1216_p0 }
  0x68   : > { %1226 = shalt.err (!%p1223_p6)
}
  0x69   : > { %s1227_s20 = scalar_lea.vmem %s1536_s14, 256  ;;  %s1323_s21 = smov [#allocation2]  }
  0x6a   : > { %p1228_p10 = scmp.ne.s32.totalorder %s1536_s14, %s1227_s20  ;;  %s1232_s16 = sshll.u32 %s1323_s21, 4  ;;  %s1233_s16 = int_to_ptr.vmem [resolvable:$false] %s1232_s16 }
  0x6b   : > { %s1234_s29 = scalar_lea.vmem %s1233_s16, 512  ;;  %p1235_p12 = scmp.lt.s32.totalorder %s1536_s14, %s1233_s16 }
  0x6c   : > { %p1230_p3 = pnand %p1228_p10, %p1214_p9  ;;  %p1236_p1 = scmp.lt.s32.totalorder %s1234_s29, %s1227_s20 }
  0x6e   : > { %p1231_p7 = pneg %p1230_p3  ;;  %p1237_p2 = por %p1236_p1, %p1235_p12 }
  0x70   : > { %p1238_p4 = pnand %p1237_p2, %p1231_p7 }
  0x72   : > { %1241 = shalt.err (!%p1238_p4)
}
  0x73   : > { %1072 = dma.hbm_to_vmem [thread:$0]  (!%p1532_p11), %s1530_s10, 256, %s1536_s14, %s1538_s12, %s1321_s13, %s1321_s13, %s1322_s15  }
  0x74   : > { %p1676_p9 = scmp.ne.s32.totalorder %s1670_s9, 0 }
  0x75   : > { %s1572_s17 = sand.u32 (!%p1676_p9), 1, %s1308_s25   ;;  %p1677_p0 = scmp.ne.s32.totalorder (!%p1676_p9), %s1667_s30, 0 }
  0x76   : > { %292 = sbr.rel (%p1676_p9) target bundleno = 845 (0x34d), region = 48  ;;  %s773_s23 = sshll.u32 (!%p1676_p9), %s1572_s17, 4 }
  0x77   : > { %s295_s11 = scalar_lea.sflag (!%p1676_p9), [#allocation3], %s1572_s17  ;;  %s1578_s8 = scalar_lea.vmem (!%p1676_p9), [#allocation2], %s773_s23 }
  0x7d   : > { %1287 = dma.done.wait (%p1677_p0), %s295_s11, 256  }
  0x7e   : > { %1289 = vsyncadd (%p1677_p0), %s295_s11, 4294967040  ;;  %p1678_p11 = scmp.eq.s32.totalorder %s1388_s28, 0 }
  0x80   : > { %1291 = dma.done.wait (%p1678_p11), [#allocation6], 4096   ;;  %p1679_p8 = pmov %p1678_p11 }
  0x82   : > { %1293 = vsyncadd (%p1679_p8), [#allocation6], 4294963200  ;;  %p1680_p13 = pmov %p1679_p8 }
  0x83   : > { %p1681_p6 = pmov %p1679_p8 }
  0x84   : > { %1295 = dma.done.wait (%p1680_p13), [#allocation9], 2048  }
  0x85   : > { %1297 = vsyncadd (%p1681_p6), [#allocation9], 4294965248  ;;  %v345_v0 = vld [vmem:[#allocation5] sm:$0xff]  ;;  %v346_v1 = vld [vmem:[#allocation5 + $0x8] sm:$0xff]  ;;  %s787_s12 = sshll.u32 %s1388_s28, 8  ;;  %s340_s20 = scalar_lea.vmem [#allocation10], %s773_s23 }
  0x86   : > { %v347_v2 = vld [vmem:[#allocation5 + $0x10] sm:$0xff]  ;;  %v947_v3 = vpack.c.bf16 %v346_v1, %v345_v0  ;;  %v348_v4 = vld [vmem:[#allocation5 + $0x18] sm:$0xff]  ;;  %v349_v6 = vld [vmem:[#allocation5 + $0x20] sm:$0xff]  ;;  %s661_s21 = sshll.u32 %s340_s20, 4  ;;  %s1609_s11 = scalar_lea.hbm %s1662_s7, %s787_s12  ;;  %s1611_s21 = int_to_ptr.vmem [resolvable:$true] %s661_s21 }
  0x87   : > { %v951_v5 = vpack.c.bf16 %v348_v4, %v347_v2  ;;  %v350_v7 = vld [vmem:[#allocation5 + $0x28] sm:$0xff]  ;;  %v351_v9 = vld [vmem:[#allocation5 + $0x30] sm:$0xff]  ;;  %v352_v10 = vld [vmem:[#allocation5 + $0x38] sm:$0xff]  ;;  %s1242_s30 = scalar_lea.vmem %s1611_s21, 256  ;;  %s1324_s28 = smov [#allocation10]  }
  0x88   : > { %948 = vmatprep.subr.bf16.mxu0 %v947_v3  ;;  %v955_v8 = vpack.c.bf16 %v350_v7, %v349_v6  ;;  %v343_v11 = vld [vmem:[%s1578_s8] sm:$0xff]  ;;  %v446_v13 = vld [vmem:[#allocation7 + $0x8] sm:$0xff]  ;;  %v448_v16 = vld [vmem:[#allocation7 + $0x18] sm:$0xff]  ;;  %v959_v20 = vpack.c.bf16 %v352_v10, %v351_v9  ;;  %p1243_p10 = scmp.ne.s32.totalorder %s1611_s21, %s1242_s30  ;;  %s1246_s23 = sshll.u32 %s1324_s28, 4  ;;  %s1247_s23 = int_to_ptr.vmem [resolvable:$false] %s1246_s23 }
  0x89   : > { %950 = vmatpush3.bf16.msra.mxu0 %v947_v3  ;;  %874 = vmatprep.mubr.f32.mxu0 %v343_v11  ;;  %v445_v12 = vld [vmem:[#allocation7] sm:$0xff]  ;;  %v447_v14 = vld [vmem:[#allocation7 + $0x10] sm:$0xff]  ;;  %v450_v19 = vld [vmem:[#allocation7 + $0x28] sm:$0xff]  ;;  %s1248_s9 = scalar_lea.vmem %s1247_s23, 512  ;;  %p1249_p12 = scmp.lt.s32.totalorder %s1611_s21, %s1247_s23 }
  0x8a   : > { %952 = vmatprep.subr.bf16.mxu0 %v951_v5  ;;  %v979_v15 = vpack.c.bf16 %v446_v13, %v445_v12  ;;  %v983_v17 = vpack.c.bf16 %v448_v16, %v447_v14  ;;  %v449_v18 = vld [vmem:[#allocation7 + $0x20] sm:$0xff]  ;;  %v354_v22 = vld [vmem:[#allocation5 + $0x48] sm:$0xff]  ;;  %v451_v24 = vld [vmem:[#allocation7 + $0x30] sm:$0xff]  ;;  %p1244_p3 = pnand %p1243_p10, %p1521_p5  ;;  %p1250_p1 = scmp.lt.s32.totalorder %s1248_s9, %s1242_s30 }
  0x8b   : > { %v353_v21 = vld [vmem:[#allocation5 + $0x40] sm:$0xff]  ;;  %v987_v23 = vpack.c.bf16 %v450_v19, %v449_v18  ;;  %v452_v25 = vld [vmem:[#allocation7 + $0x38] sm:$0xff]  ;;  %v355_v27 = vld [vmem:[#allocation5 + $0x50] sm:$0xff] }
  0x8c   : > { %980 = vmatprep.subr.bf16.mxu1 %v979_v15  ;;  %v963_v26 = vpack.c.bf16 %v354_v22, %v353_v21  ;;  %v356_v28 = vld [vmem:[#allocation5 + $0x58] sm:$0xff]  ;;  %v991_v29 = vpack.c.bf16 %v452_v25, %v451_v24  ;;  %v453_v30 = vld [vmem:[#allocation7 + $0x40] sm:$0xff]  ;;  %v454_v31 = vld [vmem:[#allocation7 + $0x48] sm:$0xff]  ;;  %p1245_p7 = pneg %p1244_p3  ;;  %p1251_p2 = por %p1250_p1, %p1249_p12 }
  0x8d   : > { %954 = vmatpush3.bf16.msra.mxu0 %v951_v5  ;;  %982 = vmatpush3.bf16.msra.mxu1 %v979_v15  ;;  %v967_v32 = vpack.c.bf16 %v356_v28, %v355_v27  ;;  %v357_v33 = vld [vmem:[#allocation5 + $0x60] sm:$0xff]  ;;  %v358_v34 = vld [vmem:[#allocation5 + $0x68] sm:$0xff]  ;;  %v995_v35 = vpack.c.bf16 %v454_v31, %v453_v30  ;;  %v455_v36 = vld [vmem:[#allocation7 + $0x50] sm:$0xff] }
  0x8e   : > { %956 = vmatprep.subr.bf16.mxu0 %v955_v8  ;;  %984 = vmatprep.subr.bf16.mxu1 %v983_v17  ;;  %v456_v37 = vld [vmem:[#allocation7 + $0x58] sm:$0xff]  ;;  %v971_v38 = vpack.c.bf16 %v358_v34, %v357_v33  ;;  %v359_v39 = vld [vmem:[#allocation5 + $0x70] sm:$0xff]  ;;  %v457_v42 = vld [vmem:[#allocation7 + $0x60] sm:$0xff]  ;;  %p1252_p4 = pnand %p1251_p2, %p1245_p7 }
  0x8f   : > { %v360_v40 = vld [vmem:[#allocation5 + $0x78] sm:$0xff]  ;;  %v999_v41 = vpack.c.bf16 %v456_v37, %v455_v36  ;;  %v458_v43 = vld [vmem:[#allocation7 + $0x68] sm:$0xff]  ;;  %v459_v47 = vld [vmem:[#allocation7 + $0x70] sm:$0xff] }
  0x90   : > { %v975_v44 = vpack.c.bf16 %v360_v40, %v359_v39  ;;  %v1003_v45 = vpack.c.bf16 %v458_v43, %v457_v42  ;;  %v344_v46 = vld [vmem:[%s1578_s8 + $0x8] sm:$0xff]  ;;  %v545_v50 = vld [vmem:[#allocation8] sm:$0xff]  ;;  %v547_v52 = vld [vmem:[#allocation8 + $0x10] sm:$0xff]  ;;  %s648_s8 = scalar_lea.sflag [#allocation4], %s1572_s17 }
  0x91   : > { %958 = vmatpush3.bf16.msra.mxu0 %v955_v8  ;;  %986 = vmatpush3.bf16.msra.mxu1 %v983_v17  ;;  %v460_v48 = vld [vmem:[#allocation7 + $0x78] sm:$0xff]  ;;  %v546_v51 = vld [vmem:[#allocation8 + $0x8] sm:$0xff]  ;;  %v549_v56 = vld [vmem:[#allocation8 + $0x20] sm:$0xff] }
  0x92   : > { %960 = vmatprep.subr.bf16.mxu0 %v959_v20  ;;  %988 = vmatprep.subr.bf16.mxu1 %v987_v23  ;;  %v1007_v49 = vpack.c.bf16 %v460_v48, %v459_v47  ;;  %v1011_v53 = vpack.c.bf16 %v546_v51, %v545_v50  ;;  %v548_v54 = vld [vmem:[#allocation8 + $0x18] sm:$0xff]  ;;  %v550_v57 = vld [vmem:[#allocation8 + $0x28] sm:$0xff]  ;;  %v551_v59 = vld [vmem:[#allocation8 + $0x30] sm:$0xff] }
  0x93   : > { %v1015_v55 = vpack.c.bf16 %v548_v54, %v547_v52  ;;  %v1019_v58 = vpack.c.bf16 %v550_v57, %v549_v56  ;;  %v552_v60 = vld [vmem:[#allocation8 + $0x38] sm:$0xff]  ;;  %v553_v62 = vld [vmem:[#allocation8 + $0x40] sm:$0xff]  ;;  %v554_v63 = vld [vmem:[#allocation8 + $0x48] sm:$0xff] }
  0x94   : > { %v1023_v61 = vpack.c.bf16 %v552_v60, %v551_v59  ;;  %v1027_v0 = vpack.c.bf16 %v554_v63, %v553_v62  ;;  %v555_v1 = vld [vmem:[#allocation8 + $0x50] sm:$0xff]  ;;  %v556_v2 = vld [vmem:[#allocation8 + $0x58] sm:$0xff]  ;;  %v557_v4 = vld [vmem:[#allocation8 + $0x60] sm:$0xff] }
  0x95   : > { %962 = vmatpush3.bf16.msra.mxu0 %v959_v20  ;;  %990 = vmatpush3.bf16.msra.mxu1 %v987_v23  ;;  %v1031_v3 = vpack.c.bf16 %v556_v2, %v555_v1  ;;  %v558_v5 = vld [vmem:[#allocation8 + $0x68] sm:$0xff]  ;;  %v778_v7 = vld [vmem:[%s1657_s2] ss:$0 sm:$0xff]  ;;  %v559_v14 = vld [vmem:[#allocation8 + $0x70] sm:$0xff] }
  0x96   : > { %964 = vmatprep.subr.bf16.mxu0 %v963_v26  ;;  %992 = vmatprep.subr.bf16.mxu1 %v991_v29  ;;  %v1035_v6 = vpack.c.bf16 %v558_v5, %v557_v4  ;;  %v560_v15 = vld [vmem:[#allocation8 + $0x78] sm:$0xff]  ;;  %v779_v17 = vld [vmem:[%s1659_s4] ss:$0 sm:$0xff] }
  0x97   : > { %v1039_v16 = vpack.c.bf16 %v560_v15, %v559_v14  ;;  %v780_v24 = vld [vmem:[%s1661_s6] ss:$0 sm:$0xff] }
  0x99   : > { %966 = vmatpush3.bf16.msra.mxu0 %v963_v26  ;;  %994 = vmatpush3.bf16.msra.mxu1 %v991_v29 }
  0x9a   : > { %968 = vmatprep.subr.bf16.mxu0 %v967_v32  ;;  %996 = vmatprep.subr.bf16.mxu1 %v995_v35 }
  0x9d   : > { %970 = vmatpush3.bf16.msra.mxu0 %v967_v32  ;;  %998 = vmatpush3.bf16.msra.mxu1 %v995_v35 }
  0x9e   : > { %972 = vmatprep.subr.bf16.mxu0 %v971_v38  ;;  %1000 = vmatprep.subr.bf16.mxu1 %v999_v41 }
  0xa1   : > { %974 = vmatpush3.bf16.msra.mxu0 %v971_v38  ;;  %1002 = vmatpush3.bf16.msra.mxu1 %v999_v41 }
  0xa2   : > { %976 = vmatprep.subr.bf16.mxu0 %v975_v44  ;;  %1004 = vmatprep.subr.bf16.mxu1 %v1003_v45 }
  0xa5   : > { %978 = vmatpush3.bf16.msra.mxu0 %v975_v44  ;;  %1006 = vmatpush3.bf16.msra.mxu1 %v1003_v45 }
  0xa6   : > { %1008 = vmatprep.subr.bf16.mxu1 %v1007_v49  ;;  %1012 = vmatprep.subr.bf16.mxu0 %v1011_v53 }
  0xa8   : > { %875 = vmatmul.mubr.f32.vlgmr.msra.gmra.mrb[0].mxu0 %v344_v46 }
  0xa9   : > { %1010 = vmatpush3.bf16.msra.mxu1 %v1007_v49  ;;  %1014 = vmatpush3.bf16.msra.mxu0 %v1011_v53 }
  0xaa   : > { %1016 = vmatprep.subr.bf16.mxu0 %v1015_v55 }
  0xad   : > { %1018 = vmatpush3.bf16.msra.mxu0 %v1015_v55 }
  0xae   : > { %1020 = vmatprep.subr.bf16.mxu0 %v1019_v58 }
  0xb1   : > { %1022 = vmatpush3.bf16.msra.mxu0 %v1019_v58 }
  0xb2   : > { %1024 = vmatprep.subr.bf16.mxu0 %v1023_v61 }
  0xb5   : > { %1026 = vmatpush3.bf16.msra.mxu0 %v1023_v61 }
  0xb6   : > { %1028 = vmatprep.subr.bf16.mxu0 %v1027_v0 }
  0xb9   : > { %1030 = vmatpush3.bf16.msra.mxu0 %v1027_v0 }
  0xba   : > { %1032 = vmatprep.subr.bf16.mxu0 %v1031_v3 }
  0xbd   : > { %1034 = vmatpush3.bf16.msra.mxu0 %v1031_v3 }
  0xbe   : > { %1036 = vmatprep.subr.bf16.mxu0 %v1035_v6 }
  0xc1   : > { %1038 = vmatpush3.bf16.msra.mxu0 %v1035_v6 }
  0xc2   : > { %1040 = vmatprep.subr.bf16.mxu0 %v1039_v16 }
  0xc5   : > { %1042 = vmatpush3.bf16.msra.mxu0 %v1039_v16 }
 0x17b   : > { %v876_v8 = vpop.f32.mrb[0].mxu0 }
 0x17c   : > { %v440_v9 = vadd.f32 %v876_v8, %v778_v7  ;;  %v434_v10 = vpop.f32.mrb[1].mxu0 }
 0x17d   : > { %v435_v11 = vadd.f32 %v778_v7, %v434_v10 }
 0x17e   : > { %v444_v13 = vmax.f32 %v440_v9, 0.0 }
 0x17f   : > { %v443_v12 = vmax.f32 %v435_v11, 0.0 }
 0x181   : > { %909 = vmatprep.mubr.f32.mxu1 %v443_v12 }
 0x182   : > { %910 = vmatmul.mubr.f32.vlgmr.msra.gmra.mrb[0].mxu1 %v444_v13 }
 0x255   : > { %v911_v18 = vpop.f32.mrb[0].mxu1 }
 0x256   : > { %v540_v19 = vadd.f32 %v911_v18, %v779_v17  ;;  %v534_v20 = vpop.f32.mrb[1].mxu1 }
 0x257   : > { %v535_v21 = vadd.f32 %v779_v17, %v534_v20 }
 0x258   : > { %v544_v23 = vmax.f32 %v540_v19, 0.0 }
 0x259   : > { %v543_v22 = vmax.f32 %v535_v21, 0.0 }
 0x25b   : > { %944 = vmatprep.mubr.f32.mxu0 %v543_v22 }
 0x25c   : > { %945 = vmatmul.mubr.f32.vlgmr.msra.gmra.mrb[2].mxu0 %v544_v23 }
 0x32f   : > { %v946_v25 = vpop.f32.mrb[2].mxu0 }
 0x330   : > { %v640_v26 = vadd.f32 %v946_v25, %v780_v24  ;;  %v634_v27 = vpop.f32.mrb[3].mxu0 }
 0x331   : > { %v635_v28 = vadd.f32 %v780_v24, %v634_v27 }
 0x332   : > { %1124 = vtanh.f32 %v640_v26 }
 0x333   : > { %1126 = vtanh.f32 %v635_v28 }
 0x33c   : > { %v1125_v29 = vpop.eup %1124 }
 0x33d   : > { %v1127_v30 = vpop.eup %1126  ;;  %646 = vst [vmem:[%s340_s20 + $0x8] sm:$0xff] %v1125_v29 }
 0x33e   : > { %645 = vst [vmem:[%s340_s20] sm:$0xff] %v1127_v30 }
 0x33f   : > { %1255 = shalt.err (!%p1252_p4)
}
 0x340   : > { %s1256_s13 = scalar_lea.hbm %s1609_s11, 256  ;;  %s1260_s14 = scalar_lea.hbm %s1662_s7, 512 }
 0x341   : > { %p1257_p9 = scmp.ne.s32.totalorder %s1609_s11, %s1256_s13  ;;  %p1261_p8 = scmp.lt.u32.totalorder %s1609_s11, %s1662_s7 }
 0x342   : > { %p1262_p13 = scmp.lt.u32.totalorder %s1260_s14, %s1256_s13  ;;  %p1264_p10 = scmp.lt.u32.totalorder %s1256_s13, %s1609_s11 }
 0x343   : > { %p1258_p0 = pnand %p1257_p9, %p1521_p5 }
 0x344   : > { %p1263_p6 = por %p1262_p13, %p1261_p8 }
 0x345   : > { %p1259_p11 = pneg %p1258_p0 }
 0x346   : > { %p1265_p3 = por %p1264_p10, %p1263_p6 }
 0x348   : > { %p1266_p7 = pnand %p1265_p3, %p1259_p11 }
 0x34a   : > { %1269 = shalt.err (!%p1266_p7)
}
 0x34b   : > { %s1325_s16 = smov 128   ;;  %s1326_s29 = smov 8  }
 0x34c   : > { %1057 = dma.vmem_to_hbm [thread:$0]  (%p1521_p5), %s1611_s21, 256, %s1609_s11, %s648_s8, %s1325_s16, %s1325_s16, %s1326_s29  }
 0x34d PF: > { %s1682_s30 = sld [smem:[#allocation15_spill]]  ;;  %s676_s28 = sand.u32 1, %s1304_s24  }
 0x34e   : > { %p1684_p1 = scmp.ge.s32.totalorder %s1316_s27, 2  ;;  %s677_s23 = scalar_lea.sflag [#allocation4], %s676_s28 }
 0x353   : > { %p1683_p12 = scmp.ne.s32.totalorder %s1682_s30, 0 }
 0x355   : > { %p1074_p2 = pnand %p1684_p1, %p1683_p12 }
 0x357   : > { %1299 = dma.done.wait (!%p1074_p2), %s677_s23, 256  }
 0x358   : > { %1301 = vsyncadd (!%p1074_p2), %s677_s23, 4294967040  ;;  %p22_p4 = scmp.ge.s32.totalorder %s1507_s22, 4   ;;  %s1685_s24 = smov %s1308_s25 }
 0x359   : > { %s1686_s25 = smov %s1312_s26  ;;  %s1687_s26 = smov %s1517_s18 }
 0x35a   : > { %s1688_s27 = smov %s1507_s22  ;;  %24 = sbr.rel (!%p22_p4) target bundleno = 7 (0x7), region = 105 }
 0x361   :  { %682 = vsyncpa [#allocation3], 1 }
 0x362   :  { %684 = vsyncpa [#allocation3 + $0x1], 1 }
 0x363   :  { %685 = vsyncpa [#allocation6], 1 }
 0x364   :  { %686 = vsyncpa [#allocation9], 1 }
 0x365   :  { %687 = vsyncpa [#allocation4], 1 }
 0x366   :  { %689 = vsyncpa [#allocation4 + $0x1], 1 }

</bundles_post_ra>
